<compile_context>
chip_gen: v5e
topology: v5e:2x2
jax: 0.10.0
libtpu: 0.0.40
codegen_flags: <defaults>
</compile_context>

<pallas_src>
import functools

import jax
import jax.numpy as jnp
from jax.experimental import pallas as pl
from jax.experimental.pallas import tpu as pltpu


def fn_net_kernel(xt_ref, w1_ref, b1_ref, w2_ref, b2_ref, w3_ref, b3_ref, ot_ref):
    """Feature-major forward: features on sublanes, batch on lanes.

    xt: (d_in, TB)   w1: (h, d_in)   b1: (h, 1)
    w2: (h, h)       b2: (h, 1)
    w3: (h, d_out)   b3: (d_out, 1)  out: (d_out, TB)
    """
    d_in = xt_ref.shape[0]
    d_out = ot_ref.shape[0]

    # ---- Layer 1 on the VPU: K = d_in is tiny (2); an MXU matmul here would be
    #      <2% utilized and only add MXU push/pop latency to the critical path.
    h1 = w1_ref[:, 0:1] * xt_ref[0:1, :]                    # (h,1)*(1,TB) -> (h,TB)
    for k in range(1, d_in):                                 # unrolled, d_in is static
        h1 = h1 + w1_ref[:, k:k + 1] * xt_ref[k:k + 1, :]
    h1 = jnp.tanh(h1 + b1_ref[...])                          # tanh -> EUP

    # ---- Layer 2: the only matmul worth the MXU -- (h,h) @ (h,TB), f32 accumulate.
    h2 = jnp.tanh(
        jnp.dot(w2_ref[...], h1, preferred_element_type=jnp.float32) + b2_ref[...]
    )

    # ---- Layer 3: N = d_out is tiny (1). VPU multiply + XLU sublane reduction
    #      yields a lane-dense (d_out, TB) result directly (no masked lane stores).
    rows = []
    for j in range(d_out):                                   # unrolled, d_out is static
        contrib = jnp.sum(w3_ref[:, j:j + 1] * h2, axis=0, keepdims=True)  # (1, TB)
        rows.append(contrib + b3_ref[j:j + 1, :])
    out = rows[0] if d_out == 1 else jnp.concatenate(rows, axis=0)
    ot_ref[...] = out.astype(ot_ref.dtype)


@functools.partial(jax.jit, static_argnames=("tile_b",))
def fn_net_forward(x, params, *, tile_b=None):
    """x: (B, d_in) float32. params in PyTorch nn.Linear layout. Returns (B, d_out)."""
    w1, b1 = params["w1"], params["b1"]
    w2, b2 = params["w2"], params["b2"]
    w3, b3 = params["w3"], params["b3"]

    B, d_in = x.shape
    h = w1.shape[0]
    d_out = w3.shape[0]

    # Layout plumbing (tiny XLA ops that fuse under jit, outside the kernel):
    # batch on lanes, biases as columns, last weight as (h, d_out) so the
    # kernel never transposes.
    xt = x.T                       # (d_in, B)
    b1c = b1.reshape(h, 1)
    b2c = b2.reshape(h, 1)
    w3c = w3.T                     # (h, d_out)
    b3c = b3.reshape(d_out, 1)

    # Collapse the grid for small batches; only tile when the batch is large
    # enough that lane-aligned (multiple-of-128) tiles make sense.
    if tile_b is None or tile_b >= B:
        tile_b = B
    else:
        assert tile_b % 128 == 0 and B % tile_b == 0, (
            "when tiling the batch, tile_b must be a multiple of 128 and divide B"
        )
    n_tiles = B // tile_b

    full = lambda i: (0, 0)  # weights/biases resident across the (tiny) grid

    flops = 2 * B * (d_in * h + h * h + h * d_out)
    transcendentals = 2 * B * h  # two tanh layers
    bytes_accessed = 4 * (
        B * d_in + h * d_in + h + h * h + h + h * d_out + d_out + d_out * B
    )

    out_t = pl.pallas_call(
        fn_net_kernel,
        out_shape=jax.ShapeDtypeStruct((d_out, B), x.dtype),
        grid_spec=pl.GridSpec(
            grid=(n_tiles,),
            in_specs=[
                pl.BlockSpec((d_in, tile_b), lambda i: (0, i)),
                pl.BlockSpec((h, d_in), full),
                pl.BlockSpec((h, 1), full),
                pl.BlockSpec((h, h), full),
                pl.BlockSpec((h, 1), full),
                pl.BlockSpec((h, d_out), full),
                pl.BlockSpec((d_out, 1), full),
            ],
            out_specs=pl.BlockSpec((d_out, tile_b), lambda i: (0, i)),
        ),
        compiler_params=pltpu.CompilerParams(
            dimension_semantics=("parallel",),
        ),
        cost_estimate=pl.CostEstimate(
            flops=flops,
            transcendentals=transcendentals,
            bytes_accessed=bytes_accessed,
        ),
    )(xt, w1, b1c, w2, b2c, w3c, b3c)

    return out_t.T  # (B, d_out), matching torch forward semantics


def init_params(key, input_dim, output_dim, hid_size):
    """PyTorch nn.Linear-style init: U(-1/sqrt(fan_in), 1/sqrt(fan_in)).
    Weights stored in PyTorch layout (out_features, in_features)."""
    ks = jax.random.split(key, 6)

    def lin(kw, kb, fan_in, fan_out):
        bound = 1.0 / jnp.sqrt(jnp.float32(fan_in))
        w = jax.random.uniform(kw, (fan_out, fan_in), jnp.float32, -bound, bound)
        b = jax.random.uniform(kb, (fan_out,), jnp.float32, -bound, bound)
        return w, b

    w1, b1 = lin(ks[0], ks[1], input_dim, hid_size)
    w2, b2 = lin(ks[2], ks[3], hid_size, hid_size)
    w3, b3 = lin(ks[4], ks[5], hid_size, output_dim)
    return {"w1": w1, "b1": b1, "w2": w2, "b2": b2, "w3": w3, "b3": b3}


def fn_net_reference(x, p):
    h1 = jnp.tanh(x @ p["w1"].T + p["b1"])
    h2 = jnp.tanh(h1 @ p["w2"].T + p["b2"])
    return h2 @ p["w3"].T + p["b3"]


if __name__ == "__main__":
    # 1D Ornstein-Uhlenbeck setup: FN_Net(input_dim=2, output_dim=1, hid_size=32)
    input_dim, output_dim, hid_size = 2, 1, 32
    batch = 64

    key = jax.random.PRNGKey(0)
    k_param, k_x = jax.random.split(key)
    params = init_params(k_param, input_dim, output_dim, hid_size)
    x = jax.random.normal(k_x, (batch, input_dim), dtype=jnp.float32)

    out = fn_net_forward(x, params)          # single grid step for this batch
    out = jax.block_until_ready(out)

    ref = fn_net_reference(x, params)
    assert out.shape == (batch, output_dim)
    assert jnp.allclose(out, ref, atol=1e-5, rtol=1e-5), float(
        jnp.max(jnp.abs(out - ref))
    )

    print("KERNEL_OK")
</pallas_src>

<mosaic_0001>
module attributes {stable_mosaic.version = 11 : i64} {
  func.func @fn_net_kernel(%arg0: i32, %arg1: memref<2x64xf32, #tpu.memory_space<vmem>>, %arg2: memref<32x2xf32, #tpu.memory_space<vmem>>, %arg3: memref<32x1xf32, #tpu.memory_space<vmem>>, %arg4: memref<32x32xf32, #tpu.memory_space<vmem>>, %arg5: memref<32x1xf32, #tpu.memory_space<vmem>>, %arg6: memref<32x1xf32, #tpu.memory_space<vmem>>, %arg7: memref<1x1xf32, #tpu.memory_space<vmem>>, %arg8: memref<1x64xf32, #tpu.memory_space<vmem>>) attributes {dimension_semantics = [#tpu.dimension_semantics<parallel>], iteration_bounds = array<i64: 1>, scalar_prefetch = 0 : i64, scratch_operands = 0 : i64, tpu.core_type = #tpu.core_type<tc>, window_params = [{transform_indices = @transform_0, window_bounds = array<i64: 2, 64>}, {pipeline_mode = #tpu.pipeline_mode<synchronous>, transform_indices = @transform_1, window_bounds = array<i64: 32, 2>}, {pipeline_mode = #tpu.pipeline_mode<synchronous>, transform_indices = @transform_2, window_bounds = array<i64: 32, 1>}, {pipeline_mode = #tpu.pipeline_mode<synchronous>, transform_indices = @transform_3, window_bounds = array<i64: 32, 32>}, {pipeline_mode = #tpu.pipeline_mode<synchronous>, transform_indices = @transform_4, window_bounds = array<i64: 32, 1>}, {pipeline_mode = #tpu.pipeline_mode<synchronous>, transform_indices = @transform_5, window_bounds = array<i64: 32, 1>}, {pipeline_mode = #tpu.pipeline_mode<synchronous>, transform_indices = @transform_6, window_bounds = array<i64: 1, 1>}, {transform_indices = @transform_7, window_bounds = array<i64: 1, 64>}]} {
    %c0 = arith.constant 0 : index
    %c0_0 = arith.constant 0 : index
    %0 = vector.load %arg2[%c0, %c0_0] : memref<32x2xf32, #tpu.memory_space<vmem>>, vector<32x1xf32>
    %c0_1 = arith.constant 0 : index
    %c0_2 = arith.constant 0 : index
    %1 = vector.load %arg1[%c0_1, %c0_2] : memref<2x64xf32, #tpu.memory_space<vmem>>, vector<1x64xf32>
    %2 = vector.broadcast %0 : vector<32x1xf32> to vector<32x64xf32>
    %3 = vector.broadcast %1 : vector<1x64xf32> to vector<32x64xf32>
    %4 = arith.mulf %2, %3 : vector<32x64xf32>
    %c0_3 = arith.constant 0 : index
    %c1 = arith.constant 1 : index
    %5 = vector.load %arg2[%c0_3, %c1] : memref<32x2xf32, #tpu.memory_space<vmem>>, vector<32x1xf32>
    %c1_4 = arith.constant 1 : index
    %c0_5 = arith.constant 0 : index
    %6 = vector.load %arg1[%c1_4, %c0_5] : memref<2x64xf32, #tpu.memory_space<vmem>>, vector<1x64xf32>
    %7 = vector.broadcast %5 : vector<32x1xf32> to vector<32x64xf32>
    %8 = vector.broadcast %6 : vector<1x64xf32> to vector<32x64xf32>
    %9 = arith.mulf %7, %8 : vector<32x64xf32>
    %10 = arith.addf %4, %9 : vector<32x64xf32>
    %c0_6 = arith.constant 0 : index
    %c0_7 = arith.constant 0 : index
    %11 = vector.load %arg3[%c0_6, %c0_7] : memref<32x1xf32, #tpu.memory_space<vmem>>, vector<32x1xf32>
    %12 = vector.broadcast %11 : vector<32x1xf32> to vector<32x64xf32>
    %13 = arith.addf %10, %12 : vector<32x64xf32>
    %14 = math.tanh %13 : vector<32x64xf32>
    %c0_8 = arith.constant 0 : index
    %c0_9 = arith.constant 0 : index
    %15 = vector.load %arg4[%c0_8, %c0_9] : memref<32x32xf32, #tpu.memory_space<vmem>>, vector<32x32xf32>
    %cst = arith.constant dense<0.000000e+00> : vector<32x64xf32>
    %16 = tpu.matmul %15, %14, %cst {dimension_numbers = #tpu.dot_dimension_numbers<[1], [0], [0], [1], [0, 0, 1, 1], [], []>} : vector<32x32xf32>, vector<32x64xf32>, vector<32x64xf32> -> vector<32x64xf32>
    %c0_10 = arith.constant 0 : index
    %c0_11 = arith.constant 0 : index
    %17 = vector.load %arg5[%c0_10, %c0_11] : memref<32x1xf32, #tpu.memory_space<vmem>>, vector<32x1xf32>
    %18 = vector.broadcast %17 : vector<32x1xf32> to vector<32x64xf32>
    %19 = arith.addf %16, %18 : vector<32x64xf32>
    %20 = math.tanh %19 : vector<32x64xf32>
    %c0_12 = arith.constant 0 : index
    %c0_13 = arith.constant 0 : index
    %21 = vector.load %arg6[%c0_12, %c0_13] : memref<32x1xf32, #tpu.memory_space<vmem>>, vector<32x1xf32>
    %22 = vector.broadcast %21 : vector<32x1xf32> to vector<32x64xf32>
    %23 = arith.mulf %22, %20 : vector<32x64xf32>
    %cst_14 = arith.constant dense<0.000000e+00> : vector<64xf32>
    %24 = vector.multi_reduction <add>, %23, %cst_14 [0] : vector<32x64xf32> to vector<64xf32>
    %25 = vector.shape_cast %24 : vector<64xf32> to vector<1x64xf32>
    %c0_15 = arith.constant 0 : index
    %c0_16 = arith.constant 0 : index
    %26 = vector.load %arg7[%c0_15, %c0_16] : memref<1x1xf32, #tpu.memory_space<vmem>>, vector<1x1xf32>
    %27 = vector.broadcast %26 : vector<1x1xf32> to vector<1x64xf32>
    %28 = arith.addf %25, %27 : vector<1x64xf32>
    %c0_17 = arith.constant 0 : index
    %c0_18 = arith.constant 0 : index
    %29 = vector.load %arg8[%c0_17, %c0_18] : memref<1x64xf32, #tpu.memory_space<vmem>>, vector<1x64xf32>
    tpu.vector_store %arg8[%c0_17, %c0_18], %28 {strides = array<i32>} : memref<1x64xf32, #tpu.memory_space<vmem>>, vector<1x64xf32>,
    return
  }
  func.func @transform_0(%arg0: i32) -> (i32, i32) {
    %c0_i32 = arith.constant 0 : i32
    %c0_i32_0 = arith.constant 0 : i32
    return %c0_i32, %arg0 : i32, i32
  }
  func.func @transform_1(%arg0: i32) -> (i32, i32) {
    %c0_i32 = arith.constant 0 : i32
    %c0_i32_0 = arith.constant 0 : i32
    %c0_i32_1 = arith.constant 0 : i32
    return %c0_i32, %c0_i32_0 : i32, i32
  }
  func.func @transform_2(%arg0: i32) -> (i32, i32) {
    %c0_i32 = arith.constant 0 : i32
    %c0_i32_0 = arith.constant 0 : i32
    %c0_i32_1 = arith.constant 0 : i32
    return %c0_i32, %c0_i32_0 : i32, i32
  }
  func.func @transform_3(%arg0: i32) -> (i32, i32) {
    %c0_i32 = arith.constant 0 : i32
    %c0_i32_0 = arith.constant 0 : i32
    %c0_i32_1 = arith.constant 0 : i32
    return %c0_i32, %c0_i32_0 : i32, i32
  }
  func.func @transform_4(%arg0: i32) -> (i32, i32) {
    %c0_i32 = arith.constant 0 : i32
    %c0_i32_0 = arith.constant 0 : i32
    %c0_i32_1 = arith.constant 0 : i32
    return %c0_i32, %c0_i32_0 : i32, i32
  }
  func.func @transform_5(%arg0: i32) -> (i32, i32) {
    %c0_i32 = arith.constant 0 : i32
    %c0_i32_0 = arith.constant 0 : i32
    %c0_i32_1 = arith.constant 0 : i32
    return %c0_i32, %c0_i32_0 : i32, i32
  }
  func.func @transform_6(%arg0: i32) -> (i32, i32) {
    %c0_i32 = arith.constant 0 : i32
    %c0_i32_0 = arith.constant 0 : i32
    %c0_i32_1 = arith.constant 0 : i32
    return %c0_i32, %c0_i32_0 : i32, i32
  }
  func.func @transform_7(%arg0: i32) -> (i32, i32) {
    %c0_i32 = arith.constant 0 : i32
    %c0_i32_0 = arith.constant 0 : i32
    return %c0_i32, %arg0 : i32, i32
  }
}

</mosaic_0001>

<bundles_post_ra>
// kernel: fn_net_forward.1
= control target key start
LH: loop header
LB: loop body
LE: loop exit
PB: predicated region body
PF: predicated region fallthrough
CT: control target
= control target key end

     0   :  { %s446_s0 = inlined_call_operand.vmem [shape: f32[2,64], index: 0, kind: input, shape index: {}]   ;;  %s447_s1 = inlined_call_operand.vmem [shape: f32[32,2], index: 1, kind: input, shape index: {}]   ;;  %s448_s2 = inlined_call_operand.vmem [shape: f32[32,1], index: 2, kind: input, shape index: {}]   ;;  %s449_s3 = inlined_call_operand.vmem [shape: f32[32,32], index: 3, kind: input, shape index: {}]   ;;  %s450_s4 = inlined_call_operand.vmem [shape: f32[32,1], index: 4, kind: input, shape index: {}]   ;;  %s451_s5 = inlined_call_operand.vmem [shape: f32[32,1], index: 5, kind: input, shape index: {}]   ;;  %s452_s6 = inlined_call_operand.<no memory space> [shape: f32[1,1], index: 6, kind: input, shape index: {}]   ;;  %s453_s7 = inlined_call_operand.hbm [shape: f32[1,64], index: 7, kind: output, shape index: {}]  }
   0x1   :  { %v12_v0 = vstv %s452_s6 }
   0x2   :  { %13 = vst [vmem:[#allocation2] sm:$0x1] %v12_v0 }
   0x3   :  { %v32_v1 = vld [vmem:[%s447_s1 + $0x18] sm:$0xff]  ;;  %v31_v2 = vld [vmem:[%s447_s1 + $0x10] sm:$0xff]  ;;  %v30_v3 = vld [vmem:[%s447_s1 + $0x8] sm:$0xff]  ;;  %v331_v4 = vmov 0  }
   0x4   :  { %282 = vset.pattern.permute.xlu2 %v331_v4  ;;  %280 = vset.pattern.permute.xlu1 %v331_v4 }
   0x5   :  { %278 = vset.pattern.permute.xlu0 %v331_v4  ;;  %46 = vperm.xlu1 %280, %v31_v2  }
   0x6   :  { %51 = vperm.xlu0 %278, %v32_v1   ;;  %41 = vperm.xlu2 %282, %v30_v3  }
   0x7   :  { %14 = vsyncpa [#allocation4], 0  ;;  %v332_v5 = vmov 1   ;;  %v29_v6 = vld [vmem:[%s447_s1] sm:$0xff]  ;;  %v88_v7 = vld [vmem:[%s448_s2 + $0x18] sm:$0xff]  ;;  %vm145_vm0 = vcmask 261120  }
   0x8   :  { %v87_v8 = vld [vmem:[%s448_s2 + $0x10] sm:$0xff]  ;;  %v85_v9 = vld [vmem:[%s448_s2] sm:$0xff]  ;;  %v86_v10 = vld [vmem:[%s448_s2 + $0x8] sm:$0xff]  ;;  %vm219_vm1 = vcmask 523264   ;;  %s250_s19 = sshll.u32 %s453_s7, 4  ;;  %vm241_vm2 = vcmask 516096   ;;  %s251_s19 = int_to_ptr.hbm [resolvable:$true] %s250_s19 }
   0x9   :  { %v121_v11 = vld [vmem:[%s450_s4] sm:$0xff]  ;;  %v122_v13 = vld [vmem:[%s450_s4 + $0x8] sm:$0xff]  ;;  %v123_v14 = vld [vmem:[%s450_s4 + $0x10] sm:$0xff] }
   0xa   :  { %v191_v12 = vld [vmem:[%s451_s5] sm:$0xff]  ;;  %v194_v15 = vld [vmem:[%s451_s5 + $0x18] sm:$0xff]  ;;  %v192_v17 = vld [vmem:[%s451_s5 + $0x8] sm:$0xff] }
   0xb   :  { %v124_v16 = vld [vmem:[%s450_s4 + $0x18] sm:$0xff]  ;;  %v193_v18 = vld [vmem:[%s451_s5 + $0x10] sm:$0xff]  ;;  %v233_v19 = vld [vmem:[#allocation2] sm:$0x1] }
   0xc   :  { %v288_v26 = vld [vmem:[%s446_s0 + $0x1] ss:$0 sm:$0xff]  ;;  %v287_v27 = vld [vmem:[%s446_s0] ss:$0 sm:$0xff]  ;;  %v118_v55 = vld [vmem:[%s449_s3 + $0x8] sm:$0xff] }
   0xd   :  { %281 = vset.pattern.permute.xlu1 %v332_v5  ;;  %v117_v54 = vld [vmem:[%s449_s3] sm:$0xff]  ;;  %v119_v56 = vld [vmem:[%s449_s3 + $0x10] sm:$0xff]  ;;  %v120_v57 = vld [vmem:[%s449_s3 + $0x18] sm:$0xff]  ;;  %s333_s3 = smov [#allocation3]  }
   0xe   :  { %279 = vset.pattern.permute.xlu0 %v332_v5  ;;  %283 = vset.pattern.permute.xlu2 %v332_v5  ;;  %s248_s17 = sshll.u32 %s333_s3, 4  ;;  %s249_s17 = int_to_ptr.vmem [resolvable:$true] %s248_s17 }
   0xf   :  { %73 = vperm.xlu0 %279, %v32_v1   ;;  %69 = vperm.xlu1 %281, %v31_v2  }
  0x10   :  { %65 = vperm.xlu2 %283, %v30_v3  }
  0x17   :  { %284 = vset.pattern.permute.xlu1 %v331_v4  ;;  %61 = vperm.xlu0 %279, %v29_v6  }
  0x18   :  { %285 = vset.pattern.permute.xlu2 %v331_v4  ;;  %106 = vperm.xlu1 %284, %v88_v7  }
  0x19   :  { %36 = vperm.xlu2 %285, %v29_v6  }
  0x1f   :  { %286 = vset.pattern.permute.xlu0 %v331_v4 }
  0x20   :  { %101 = vperm.xlu1 %284, %v87_v8   ;;  %91 = vperm.xlu0 %286, %v85_v9  }
  0x21   :  { %96 = vperm.xlu2 %285, %v86_v10  }
  0x28   :  { %127 = vperm.xlu1 %284, %v121_v11   ;;  %197 = vperm.xlu0 %286, %v191_v12  }
  0x29   :  { %132 = vperm.xlu2 %285, %v122_v13  }
  0x30   :  { %137 = vperm.xlu1 %284, %v123_v14   ;;  %212 = vperm.xlu0 %286, %v194_v15  }
  0x31   :  { %142 = vperm.xlu2 %285, %v124_v16  }
  0x38   :  { %202 = vperm.xlu1 %284, %v192_v17  }
  0x39   :  { %207 = vperm.xlu2 %285, %v193_v18  }
  0x40   :  { %236 = vperm.xlu1 %284, %v233_v19  }
  0x60   :  { %v42_v20 = vpop.permute.xlu2 %41 }
  0x61   :  { %v56_v34 = vmul.f32 %v287_v27, %v42_v20 }
  0x6a   :  { %v66_v23 = vpop.permute.xlu2 %65 }
  0x6b   :  { %v78_v35 = vmul.f32 %v288_v26, %v66_v23 }
  0x6d   :  { %v82_v40 = vadd.f32 %v78_v35, %v56_v34 }
  0x73   :  { %v37_v29 = vpop.permute.xlu2 %36 }
  0x74   :  { %v55_v38 = vmul.f32 %v287_v27, %v37_v29 }
  0x77   :  { %v47_v21 = vpop.permute.xlu1 %46 }
  0x78   :  { %v52_v22 = vpop.permute.xlu0 %51  ;;  %v57_v39 = vmul.f32 %v287_v27, %v47_v21 }
  0x79   :  { %v58_v30 = vmul.f32 %v287_v27, %v52_v22 }
  0x7b   :  { %v97_v42 = vpop.permute.xlu2 %96 }
  0x7c   :  { %v110_v47 = vadd.f32 %v97_v42, %v82_v40 }
  0x81   :  { %v74_v24 = vpop.permute.xlu0 %73  ;;  %v70_v25 = vpop.permute.xlu1 %69 }
  0x82   :  { %v80_v28 = vmul.f32 %v288_v26, %v74_v24  ;;  %v79_v37 = vmul.f32 %v288_v26, %v70_v25 }
  0x83   :  { %v133_v59 = vpop.permute.xlu2 %132 }
  0x84   :  { %v84_v32 = vadd.f32 %v80_v28, %v58_v30  ;;  %v83_v43 = vadd.f32 %v79_v37, %v57_v39 }
  0x89   :  { %v62_v31 = vpop.permute.xlu0 %61 }
  0x8a   :  { %v107_v33 = vpop.permute.xlu1 %106  ;;  %v77_v41 = vmul.f32 %v288_v26, %v62_v31 }
  0x8b   :  { %v112_v36 = vadd.f32 %v107_v33, %v84_v32  ;;  %v143_v1 = vpop.permute.xlu2 %142 }
  0x8c   :  { %v81_v49 = vadd.f32 %v77_v41, %v55_v38 }
  0x8d   :  { %289 = vtanh.f32 %v112_v36 }
  0x92   :  { %v102_v44 = vpop.permute.xlu1 %101  ;;  %v92_v45 = vpop.permute.xlu0 %91 }
  0x93   :  { %v290_v46 = vpop.eup %289  ;;  %v111_v48 = vadd.f32 %v102_v44, %v83_v43  ;;  %v109_v50 = vadd.f32 %v92_v45, %v81_v49  ;;  %v208_v15 = vpop.permute.xlu2 %207 }
  0x94   :  { %170 = vmatpush.msra.mxu0 %v290_v46  ;;  %263 = vmatpush.msra.mxu1 %v290_v46 }
  0x95   :  { %291 = vtanh.f32 %v111_v48  ;;  %264 = vmatpush.msra.mxu2 %v290_v46  ;;  %265 = vmatpush.msra.mxu3 %v290_v46 }
  0x96   :  { %293 = vtanh.f32 %v110_v47 }
  0x97   :  { %295 = vtanh.f32 %v109_v50 }
  0x9a   :  { %v128_v58 = vpop.permute.xlu1 %127  ;;  %v198_v2 = vpop.permute.xlu0 %197 }
  0x9b   :  { %v292_v51 = vpop.eup %291 }
  0x9c   :  { %171 = vmatpush.msra.mxu0 %v292_v51  ;;  %266 = vmatpush.msra.mxu1 %v292_v51  ;;  %v294_v52 = vpop.eup %293 }
  0x9d   :  { %267 = vmatpush.msra.mxu2 %v292_v51  ;;  %268 = vmatpush.msra.mxu3 %v292_v51  ;;  %v296_v53 = vpop.eup %295 }
  0x9e   :  { %172 = vmatpush.msra.mxu0 %v294_v52  ;;  %269 = vmatpush.msra.mxu1 %v294_v52 }
  0x9f   :  { %270 = vmatpush.msra.mxu2 %v294_v52  ;;  %271 = vmatpush.msra.mxu3 %v294_v52 }
  0xa0   :  { %173 = vmatpush.msra.mxu0 %v296_v53  ;;  %272 = vmatpush.msra.mxu1 %v296_v53 }
  0xa1   :  { %273 = vmatpush.msra.mxu2 %v296_v53  ;;  %274 = vmatpush.msra.mxu3 %v296_v53 }
  0xa2   :  { %259 = vmatmul.msk.f32.vlgmr.msra.gmra.mxu0 %vm145_vm0, %v117_v54  ;;  %260 = vmatmul.msk.f32.vlgmr.msra.gmra.mxu1 %vm145_vm0, %v118_v55  ;;  %v138_v60 = vpop.permute.xlu1 %137  ;;  %v213_v17 = vpop.permute.xlu0 %212 }
  0xa3   :  { %261 = vmatmul.msk.f32.vlgmr.msra.gmra.mxu2 %vm145_vm0, %v119_v56  ;;  %262 = vmatmul.msk.f32.vlgmr.msra.gmra.mxu3 %vm145_vm0, %v120_v57 }
  0xaa   :  { %v203_v9 = vpop.permute.xlu1 %202 }
  0xb2   :  { %v237_v29 = vpop.permute.xlu1 %236 }
  0xb3   :  { %v239_v31 = vperm.slane %v237_v29, 0 }
 0x11f   :  { %v175_v61 = vpop.f32.mrf.mxu0  ;;  %v178_v62 = vpop.f32.mrf.mxu1 }
 0x120   :  { %v176_v63 = vadd.f32 %v175_v61, %v128_v58  ;;  %v179_v0 = vadd.f32 %v178_v62, %v133_v59 }
 0x122   :  { %297 = vtanh.f32 %v176_v63 }
 0x123   :  { %299 = vtanh.f32 %v179_v0 }
 0x126   :  { %v181_v3 = vpop.f32.mrf.mxu2  ;;  %v184_v4 = vpop.f32.mrf.mxu3 }
 0x127   :  { %v182_v5 = vadd.f32 %v181_v3, %v138_v60  ;;  %v185_v6 = vadd.f32 %v184_v4, %v143_v1 }
 0x128   :  { %v298_v7 = vpop.eup %297 }
 0x129   :  { %v300_v8 = vpop.eup %299  ;;  %301 = vtanh.f32 %v182_v5  ;;  %v215_v10 = vmul.f32 %v298_v7, %v198_v2 }
 0x12a   :  { %v216_v11 = vmul.f32 %v300_v8, %v203_v9  ;;  %303 = vtanh.f32 %v185_v6 }
 0x12b   :  { %v220_v12 = vsel %vm219_vm1, %v215_v10, 0.0 }
 0x12c   :  { %v221_v13 = vsel %vm219_vm1, %v216_v11, 0.0 }
 0x12d   :  { %v222_v19 = vadd.f32 %v221_v13, %v220_v12 }
 0x12f   :  { %v302_v14 = vpop.eup %301 }
 0x130   :  { %v304_v16 = vpop.eup %303  ;;  %v217_v18 = vmul.f32 %v302_v14, %v208_v15 }
 0x131   :  { %v218_v20 = vmul.f32 %v304_v16, %v213_v17 }
 0x132   :  { %v223_v21 = vsel %vm219_vm1, %v217_v18, 0.0 }
 0x133   :  { %v224_v22 = vadd.f32 %v223_v21, %v222_v19  ;;  %v225_v23 = vsel %vm219_vm1, %v218_v20, 0.0 }
 0x135   :  { %v226_v24 = vadd.f32 %v225_v23, %v224_v22 }
 0x137   :  { %v227_v25 = vrot.slane %v226_v24, 4 }
 0x139   :  { %v228_v26 = vadd.f32 %v227_v25, %v226_v24 }
 0x13b   :  { %v229_v27 = vrot.slane %v228_v26, 2 }
 0x13d   :  { %v230_v28 = vadd.f32 %v229_v27, %v228_v26 }
 0x13f   :  { %v231_v30 = vrot.slane %v230_v28, 1 }
 0x141   :  { %v232_v32 = vadd.f32 %v231_v30, %v230_v28 }
 0x143   :  { %v240_v33 = vadd.f32 %v239_v31, %v232_v32 }
 0x145   :  { %242 = vst.msk [vmem:[#allocation3] sm:$0x1] %vm241_vm2, %v240_v33 }
 0x146   :  { %253 = dma.vmem_to_hbm [thread:$0]  %s249_s17, 16, %s251_s19, [#allocation4]  }
 0x147   :  { %329 = dma.done.wait [#allocation4], 16  }
 0x148   :  { %330 = vsyncadd [#allocation4], 4294967280 }
 0x149   :  { %258 = vsyncpa [#allocation4], 1 }

</bundles_post_ra>
